<compile_context>
chip_gen: v7x
topology: tpu7x:2x2x1
jax: 0.10.0
libtpu: 0.0.40
codegen_flags: <defaults>
</compile_context>

<pallas_src>
import math

import jax
import jax.numpy as jnp
from jax.experimental import pallas as pl
from jax.experimental.pallas import tpu as pltpu


# ----------------------------------------------------------------------------
# small helpers
# ----------------------------------------------------------------------------
def _round_up(x, m):
    return ((x + m - 1) // m) * m


def _sublane_mult(dtype):
    # minimum second-minor block multiple: (8,128) f32, (16,128) bf16, (32,128) int8/fp8
    return {4: 8, 2: 16, 1: 32}[jnp.dtype(dtype).itemsize]


# ----------------------------------------------------------------------------
# Parameter-only subchain assembly (mirrors TensorContractionLayer.subchain).
# Pure JAX, data independent, tiny -- done once at init, cached on the layer.
# ----------------------------------------------------------------------------
def _build_chain(cores, d):
    """Ring product of all cores except d, in the torch module's order.

    chain[r0, n_{order[0]}, ..., n_{order[D-2]}, r1] with
    order = [(d+1)%D, ..., (d-1)%D].
    """
    D = len(cores)
    order = [(d + 1 + k) % D for k in range(D - 1)]
    chain = jnp.transpose(cores[order[0]], (1, 0, 2))          # (R, N, R)
    for c in order[1:]:
        chain = jnp.tensordot(chain, jnp.transpose(cores[c], (1, 0, 2)),
                              axes=([-1], [0]))
    return chain, order


def _build_mode_matrix(cores, shape, rank, d):
    """K_d with axes (n_{others, increasing mode order}..., R*R).

    Flattened to (P/shape[d], R*R) it is exactly the weight of the per-mode
    matmul: latent[d] = reshape(moveaxis(x, d+1, 1), (B*shape[d], P/shape[d])) @ K_d.
    """
    D = len(shape)
    R = rank
    chain, order = _build_chain(cores, d)
    others = [c for c in range(D) if c != d]
    # chain axes (r0, n_{order[0]}, ..., n_{order[D-2]}, r1)
    #   -> (n_{others increasing}, r0, r1) -> flatten (r0, r1).
    perm = [order.index(c) + 1 for c in others] + [0, D]
    return jnp.transpose(chain, perm).reshape([shape[c] for c in others] + [R * R])


def _build_dense_matrix(cores, shape, rank):
    """Delta-expanded fused operand E : (P, sum_d shape[d]*R*R) (toy shapes only)."""
    D = len(shape)
    R = rank
    P = math.prod(shape)
    blocks, head_dims = [], []
    for d in range(D):
        k_nat = _build_mode_matrix(cores, shape, rank, d)
        k_exp = jnp.expand_dims(jnp.expand_dims(k_nat, axis=d), axis=D)
        eye = jnp.eye(shape[d], dtype=k_nat.dtype).reshape(
            [shape[c] if c == d else 1 for c in range(D)] + [shape[d], 1])
        blocks.append((k_exp * eye).reshape(P, shape[d] * R * R))
        head_dims.append(shape[d] * R * R)
    return jnp.concatenate(blocks, axis=1), head_dims


# ----------------------------------------------------------------------------
# Generic tiled Pallas matmul (MXU, f32 accumulation), used by both paths.
# ----------------------------------------------------------------------------
def _matmul_kernel(x_ref, w_ref, o_ref):
    # single-K-step variant: one MXU matmul per (i, j) tile, lane-dense store.
    o_ref[...] = jnp.dot(x_ref[...], w_ref[...],
                         preferred_element_type=jnp.float32).astype(o_ref.dtype)


def _matmul_acc_kernel(x_ref, w_ref, o_ref, acc_ref):
    # K-tiled variant: f32 VMEM accumulator, init/writeback gated with pl.when.
    @pl.when(pl.program_id(2) == 0)
    def _():
        acc_ref[...] = jnp.zeros_like(acc_ref)

    acc_ref[...] += jnp.dot(x_ref[...], w_ref[...],
                            preferred_element_type=jnp.float32)

    @pl.when(pl.program_id(2) == pl.num_programs(2) - 1)
    def _():
        o_ref[...] = acc_ref[...].astype(o_ref.dtype)


_VMEM_BUDGET = 20 << 20   # conservative per-step working-set target (all chips)


def _pick_m_tile(M, align):
    # Never shrink the M tile below MXU width just to create grid steps: small M
    # runs as one grid step over the whole (aligned) batch; large M uses 256-row
    # tiles (full v6e/v7x MXU height, 2x v5e's 128).
    if M <= 512:
        return _round_up(M, align)
    return 256


def _pick_n_tile(N):
    # Lane-dense output slabs.  N > 256 splits into 256-wide slabs, which gives
    # small-B / large-O cases >= 2 "parallel" grid steps (v7x megacore) without
    # collapsing the MXU M dimension.
    if N <= 256:
        return _round_up(N, 128)
    return 256


def _pick_k_tile(K, tm, tn, x_isz, w_isz, out_isz):
    # Largest K tile whose double-buffered working set fits the VMEM budget.
    fixed = 2 * tm * tn * out_isz + tm * tn * 4            # out buffers + f32 acc
    per_k = 2 * tm * x_isz + 2 * tn * w_isz                # x / w double-buffered
    cap = max((_VMEM_BUDGET - fixed) // per_k, 128)
    if K <= cap:
        return K                                           # single K step
    return max((cap // 128) * 128, 128)


def _pallas_matmul(x, w, out_dtype):
    """out = x @ w on the MXU with f32 accumulation; M/N/K tiled and padded."""
    M, K = x.shape
    K2, N = w.shape
    assert K == K2
    out_dtype = jnp.dtype(out_dtype)
    x_isz, w_isz, out_isz = x.dtype.itemsize, w.dtype.itemsize, out_dtype.itemsize

    tm = _pick_m_tile(M, _sublane_mult(x.dtype))
    tn = _pick_n_tile(N)
    tk = _pick_k_tile(K, tm, tn, x_isz, w_isz, out_isz)

    M_pad, N_pad, K_pad = _round_up(M, tm), _round_up(N, tn), _round_up(K, tk)
    if (M_pad, K_pad) != (M, K):
        x = jnp.pad(x, ((0, M_pad - M), (0, K_pad - K)))
    if (K_pad, N_pad) != (K, N):
        w = jnp.pad(w, ((0, K_pad - K), (0, N_pad - N)))

    gm, gn, gk = M_pad // tm, N_pad // tn, K_pad // tk

    # Explicit VMEM limit computed from the actual buffer sizes (assumes double
    # buffering even for constant-index resident operands -> upper bound), so
    # v5e's 16 MiB scoped default never binds and v7x's 64 MiB is never exceeded.
    need = (2 * tm * tk * x_isz + 2 * tk * tn * w_isz
            + 2 * tm * tn * out_isz + tm * tn * 4)
    vmem_limit = int(min(max(2 * need, 32 << 20), 64 << 20))

    cost = pl.CostEstimate(
        flops=2 * M_pad * N_pad * K_pad,
        transcendentals=0,
        # weight counted once, bytes in the actual compute dtypes
        bytes_accessed=(M_pad * K_pad * x_isz + K_pad * N_pad * w_isz
                        + M_pad * N_pad * out_isz),
    )

    if gk == 1:
        out = pl.pallas_call(
            _matmul_kernel,
            out_shape=jax.ShapeDtypeStruct((M_pad, N_pad), out_dtype),
            grid=(gm, gn),
            in_specs=[
                pl.BlockSpec((tm, tk), lambda i, j: (i, 0)),
                pl.BlockSpec((tk, tn), lambda i, j: (0, j)),   # weight slab
            ],
            out_specs=pl.BlockSpec((tm, tn), lambda i, j: (i, j)),
            compiler_params=pltpu.CompilerParams(
                dimension_semantics=("parallel", "parallel"),
                vmem_limit_bytes=vmem_limit),
            cost_estimate=cost,
        )(x, w)
    else:
        out = pl.pallas_call(
            _matmul_acc_kernel,
            out_shape=jax.ShapeDtypeStruct((M_pad, N_pad), out_dtype),
            grid=(gm, gn, gk),                                  # reduction axis last
            in_specs=[
                pl.BlockSpec((tm, tk), lambda i, j, k: (i, k)),
                pl.BlockSpec((tk, tn), lambda i, j, k: (k, j)),
            ],
            out_specs=pl.BlockSpec((tm, tn), lambda i, j, k: (i, j)),
            scratch_shapes=[pltpu.VMEM((tm, tn), jnp.float32)],
            compiler_params=pltpu.CompilerParams(
                dimension_semantics=("parallel", "parallel", "arbitrary"),
                vmem_limit_bytes=vmem_limit),
            cost_estimate=cost,
        )(x, w)

    return out[:M, :N]


# ----------------------------------------------------------------------------
# Parameter prep (cached at init) + forward
# ----------------------------------------------------------------------------
_FUSED_E_BYTES_MAX = 4 << 20   # dense delta-expanded E only when VMEM-resident-sized


def prepare_contraction_params(cores, *, compute_dtype=None, fuse=None):
    """Build, pad and cast the contraction operands once (cache on the layer)."""
    D = len(cores)
    shape = [int(c.shape[0]) for c in cores]
    R = int(cores[0].shape[1])
    P = math.prod(shape)
    cdt = jnp.dtype(compute_dtype) if compute_dtype is not None else jnp.dtype(cores[0].dtype)
    O = sum(s * R * R for s in shape)
    O_pad = _round_up(O, 128)
    if fuse is None:
        # Dense E costs ~mean(shape)x extra FLOPs/bytes (only 1/shape[d] of each
        # block is nonzero); use it only when it is tiny enough to stay resident.
        fuse = P * O_pad * cdt.itemsize <= _FUSED_E_BYTES_MAX

    params = dict(shape=shape, rank=R, dim=D, compute_dtype=cdt, fuse=bool(fuse))
    if fuse:
        E, head_dims = _build_dense_matrix(cores, shape, R)
        if O_pad != O:
            E = jnp.pad(E, ((0, 0), (0, O_pad - O)))           # lane-dense stores
        params["E"] = E.astype(cdt)
        params["head_dims"] = head_dims
    else:
        rr_pad = _round_up(R * R, 128)                          # 128-lane output group
        mats = []
        for d in range(D):
            k = _build_mode_matrix(cores, shape, R, d).reshape(-1, R * R)
            if rr_pad != R * R:
                k = jnp.pad(k, ((0, 0), (0, rr_pad - R * R)))
            mats.append(k.astype(cdt))
        params["mode_mats"] = mats
    return params


def tensor_contraction_forward(x, cores, *, params=None, compute_dtype=None, fuse=None):
    if params is None:
        params = prepare_contraction_params(cores, compute_dtype=compute_dtype, fuse=fuse)
    D, shape, R = params["dim"], params["shape"], params["rank"]
    assert x.ndim == D + 1, "x must have exactly one leading batch dimension"
    assert list(x.shape[1:]) == shape, "The shape of input incompatible!"
    B = int(x.shape[0])
    cdt = params["compute_dtype"]
    out_dtype = x.dtype

    if params["fuse"]:
        # One lane-dense matmul computes all D latent codes; x streamed once.
        y = _pallas_matmul(x.reshape(B, -1).astype(cdt), params["E"], out_dtype)
        latent, off = [], 0
        for d in range(D):
            w = params["head_dims"][d]
            latent.append(y[:, off:off + w].reshape(B, shape[d], R, R))
            off += w
        return latent

    # Block-diagonal path: per mode d a (B*shape[d], P/shape[d]) @ (P/shape[d], R^2)
    # matmul; the moveaxis/reshape is wrapper-side layout plumbing only.
    latent = []
    for d in range(D):
        xd = jnp.moveaxis(x, d + 1, 1).reshape(B * shape[d], -1).astype(cdt)
        yd = _pallas_matmul(xd, params["mode_mats"][d], out_dtype)
        latent.append(yd[:, :R * R].reshape(B, shape[d], R, R))
    return latent


# ----------------------------------------------------------------------------
# Module wrapper: deterministic parameter init + cached operands + forward
# ----------------------------------------------------------------------------
class TensorContractionLayer:
    """JAX/Pallas port of the torch TensorContractionLayer (forward only)."""

    def __init__(self, shape, rank, *, key, compute_dtype=None, fuse=None):
        self.dim = len(shape)
        self.shape = list(shape)
        self.rank = rank
        cores = []
        for d in range(self.dim):
            key, sub = jax.random.split(key)
            # torch.nn.init.xavier_normal_(core, gain=0.2) on (N, R, R):
            #   fan_in = R*R, fan_out = N*R, std = gain*sqrt(2/(fan_in+fan_out))
            fan_in = rank * rank
            fan_out = shape[d] * rank
            std = 0.2 * math.sqrt(2.0 / (fan_in + fan_out))
            cores.append(std * jax.random.normal(
                sub, (shape[d], rank, rank), jnp.float32))
        self.cores = cores
        # Cache the contraction operands (built, padded, cast) once at init.
        self.params = prepare_contraction_params(
            cores, compute_dtype=compute_dtype, fuse=fuse)

    def __call__(self, x):
        return tensor_contraction_forward(x, self.cores, params=self.params)


# ----------------------------------------------------------------------------
# Pure-JAX reference (direct mirror of the torch forward: subchain + tensordot)
# ----------------------------------------------------------------------------
def tensor_contraction_ref(x, cores):
    D = len(cores)
    out = []
    for d in range(D):
        chain, order = _build_chain(cores, d)
        x_axes = [c + 1 for c in order]
        node = jnp.tensordot(x, chain, axes=(x_axes, list(range(1, D))),
                             precision=jax.lax.Precision.HIGHEST)
        out.append(node)
    return out


if __name__ == "__main__":
    key = jax.random.PRNGKey(0)
    key, k_model, k_x = jax.random.split(key, 3)

    shape = [4, 8, 16]      # D = 3 modes, prod(shape) = 512
    rank = 4
    batch = 16

    layer = TensorContractionLayer(shape, rank, key=k_model)
    x = jax.random.normal(k_x, (batch, *shape), jnp.float32)

    # Fused path (dense E ~1 MiB, resident; single M step, two 256-wide N slabs).
    latent = layer(x)
    jax.block_until_ready(latent)

    ref = tensor_contraction_ref(x, layer.cores)
    assert len(latent) == len(ref) == len(shape)
    for d in range(len(shape)):
        assert latent[d].shape == (batch, shape[d], rank, rank)
        assert jnp.allclose(latent[d], ref[d], atol=1e-3, rtol=1e-2), \
            f"fused mode {d} mismatch"

    # Block-diagonal per-mode path (the one used for non-toy shapes).
    latent_pm = tensor_contraction_forward(x, layer.cores, fuse=False)
    jax.block_until_ready(latent_pm)
    for d in range(len(shape)):
        assert jnp.allclose(latent_pm[d], ref[d], atol=1e-3, rtol=1e-2), \
            f"per-mode mode {d} mismatch"

    # bf16 streaming with f32 accumulation (v6e/v7x fast path); looser tolerance.
    latent_bf = tensor_contraction_forward(x, layer.cores,
                                           compute_dtype=jnp.bfloat16)
    jax.block_until_ready(latent_bf)
    for d in range(len(shape)):
        assert jnp.allclose(latent_bf[d], ref[d], atol=5e-3, rtol=5e-2), \
            f"bf16 mode {d} mismatch"

    print("KERNEL_OK")
</pallas_src>

<mosaic_0001>
module attributes {stable_mosaic.version = 11 : i64} {
  func.func @_matmul_kernel(%arg0: i32, %arg1: i32, %arg2: memref<16x512xf32, #tpu.memory_space<vmem>>, %arg3: memref<512x256xf32, #tpu.memory_space<vmem>>, %arg4: memref<16x256xf32, #tpu.memory_space<vmem>>) attributes {dimension_semantics = [#tpu.dimension_semantics<parallel>, #tpu.dimension_semantics<parallel>], iteration_bounds = array<i64: 1, 2>, scalar_prefetch = 0 : i64, scratch_operands = 0 : i64, tpu.core_type = #tpu.core_type<tc>, window_params = [{transform_indices = @transform_0, window_bounds = array<i64: 16, 512>}, {transform_indices = @transform_1, window_bounds = array<i64: 512, 256>}, {transform_indices = @transform_2, window_bounds = array<i64: 16, 256>}]} {
    %c0 = arith.constant 0 : index
    %c0_0 = arith.constant 0 : index
    %0 = vector.load %arg2[%c0, %c0_0] : memref<16x512xf32, #tpu.memory_space<vmem>>, vector<16x512xf32>
    %c0_1 = arith.constant 0 : index
    %c0_2 = arith.constant 0 : index
    %1 = vector.load %arg3[%c0_1, %c0_2] : memref<512x256xf32, #tpu.memory_space<vmem>>, vector<512x256xf32>
    %cst = arith.constant dense<0.000000e+00> : vector<16x256xf32>
    %2 = tpu.matmul %0, %1, %cst {dimension_numbers = #tpu.dot_dimension_numbers<[1], [0], [0], [1], [0, 0, 1, 1], [], []>} : vector<16x512xf32>, vector<512x256xf32>, vector<16x256xf32> -> vector<16x256xf32>
    %c0_3 = arith.constant 0 : index
    %c0_4 = arith.constant 0 : index
    %3 = vector.load %arg4[%c0_3, %c0_4] : memref<16x256xf32, #tpu.memory_space<vmem>>, vector<16x256xf32>
    tpu.vector_store %arg4[%c0_3, %c0_4], %2 {strides = array<i32>} : memref<16x256xf32, #tpu.memory_space<vmem>>, vector<16x256xf32>,
    return
  }
  func.func @transform_0(%arg0: i32, %arg1: i32) -> (i32, i32) {
    %c0_i32 = arith.constant 0 : i32
    %c0_i32_0 = arith.constant 0 : i32
    return %arg0, %c0_i32 : i32, i32
  }
  func.func @transform_1(%arg0: i32, %arg1: i32) -> (i32, i32) {
    %c0_i32 = arith.constant 0 : i32
    %c0_i32_0 = arith.constant 0 : i32
    return %c0_i32, %arg1 : i32, i32
  }
  func.func @transform_2(%arg0: i32, %arg1: i32) -> (i32, i32) {
    %c0_i32 = arith.constant 0 : i32
    return %arg0, %arg1 : i32, i32
  }
}

</mosaic_0001>

<bundles_post_ra>
// kernel: tpu_custom_call.1
= control target key start
LH: loop header
LB: loop body
LE: loop exit
PB: predicated region body
PF: predicated region fallthrough
CT: control target
= control target key end

     0   :  { %7 = vsyncpa [#allocation3], 0  ;;  %s1369_s0 = inlined_call_operand.hbm [shape: f32[16,512], index: 0, kind: input, shape index: {}]   ;;  %s1370_s1 = inlined_call_operand.hbm [shape: f32[512,512], index: 1, kind: input, shape index: {}]   ;;  %s1371_s2 = inlined_call_operand.hbm [shape: f32[16,512], index: 2, kind: output, shape index: {}]  }
   0x1   :  { %8 = vsyncpa [#allocation6], 0 }
   0x2   :  { %10 = vsyncpa [#allocation6 + $0x1], 0 }
   0x3   :  { %11 = vsyncpa [#allocation4], 0 }
   0x4   :  { %13 = vsyncpa [#allocation4 + $0x1], 0  ;;  %s1015_s9 = smov 0   ;;  %s1017_s10 = smov 0  }
   0x5   :  { %s1019_s11 = smov 0   ;;  %s1021_s12 = smov 0  }
   0x6   :  { %s1023_s13 = smov 0   ;;  %s1025_s14 = smov 0  }
   0x7 LB: > { %s613_s15 = sadd.s32 4294967295, %s988_s14   ;;  %s614_s16 = sadd.s32 4294967294, %s988_s14   ;;  %s988_s14 = sphi %s1025_s14, %s19_s14   ;;  %s984_s13 = sphi %s1023_s13, %s1397_s13   ;;  %s980_s12 = sphi %s1021_s12, %s1396_s12   ;;  %s976_s11 = sphi %s1019_s11, %s1395_s11   ;;  %s972_s10 = sphi %s1017_s10, %s1394_s10   ;;  %s968_s9 = sphi %s1015_s9, %s1393_s9  }
   0x8   : > { %p71_p0 = scmp.ne.s32.totalorder %s976_s11, %s972_s10  ;;  %p72_p1 = scmp.eq.s32.totalorder %s988_s14, 0 }
   0x9   : > { %p77_p2 = scmp.ne.s32.totalorder %s972_s10, %s968_s9  ;;  %p1052_p3 = scmp.eq.s32.totalorder %s613_s15, 0 }
   0xa   : > { %p1056_p4 = por %p72_p1, %p71_p0  ;;  %p103_p5 = scmp.eq.s32.totalorder %s613_s15, 1 }
   0xb   : > { %s1378_s17 = scalar_select %p1052_p3, 1, 0 }
   0xc   : > { %p1062_p6 = por %p1052_p3, %p77_p2  ;;  %p109_p7 = scmp.eq.s32.totalorder %s614_s16, 1 }
   0xd   : > { %p1066_p8 = por %p103_p5, %p71_p0  ;;  %p615_p9 = scmp.ge.s32.totalorder %s988_s14, 1 }
   0xe   : > { %s1380_s19 = scalar_select %p1062_p6, 1, 0 }
   0xf   : > { %s1381_s20 = scalar_select %p1066_p8, 1, 0 }
  0x10   : > { %p1071_p10 = por %p109_p7, %p77_p2  ;;  %p116_p11 = scmp.lt.s32.totalorder %s988_s14, 3 }
  0x11   : > { %s990_s23 = smov [#allocation2]   ;;  %p785_p1 = scmp.lt.s32.totalorder %s988_s14, 2 }
  0x12   : > { %s1382_s21 = scalar_select %p1071_p10, 1, 0 }
  0x13   : > { %p1076_p12 = pnand %p615_p9, %p116_p11  ;;  %s132_s24 = sshll.u32 %s990_s23, 4  ;;  %s1080_s24 = int_to_ptr.vmem [resolvable:$true] %s132_s24 }
  0x14   : > { %p1094_p2 = pnand %p785_p1, %p1056_p4  ;;  %s28_s27 = sadd.s32 1, %s984_s13 }
  0x15   : > { %s1383_s22 = scalar_select %p1076_p12, 1, 0 }
  0x16   : > { %p772_p13 = pneg %p1076_p12  ;;  %s844_s30 = scalar_lea.hbm %s1369_s0, 1024 }
  0x17   : > { %s1385_s26 = scalar_select %p1094_p2, 1, 0 }
  0x18   : > { %p1088_p5 = pnand %p772_p13, %p1052_p3  ;;  %p845_p7 = scmp.ne.s32.totalorder %s1369_s0, %s844_s30 }
  0x19   : > { %p851_p4 = scmp.lt.u32.totalorder %s844_s30, %s1369_s0 }
  0x1a   : > { %p846_p9 = pneg %p1088_p5 }
  0x1c   : > { %p847_p11 = pnand %p846_p9, %p845_p7 }
  0x1e   : > { %p848_p13 = pneg %p847_p11 }
  0x20   : > { %p853_p1 = pnand %p851_p4, %p848_p13 }
  0x22   : > { %856 = shalt.err (!%p853_p1)
}
  0x23   : > { %s857_s7 = scalar_lea.vmem %s1080_s24, 1024  ;;  %p865_p6 = scmp.lt.s32.totalorder %s1080_s24, %s1080_s24 }
  0x24   : > { %p858_p0 = scmp.ne.s32.totalorder %s1080_s24, %s857_s7  ;;  %p866_p3 = scmp.lt.s32.totalorder %s857_s7, %s857_s7 }
  0x26   : > { %p860_p10 = pnand %p858_p0, %p846_p9  ;;  %p867_p12 = por %p866_p3, %p865_p6 }
  0x28   : > { %p861_p8 = pneg %p860_p10 }
  0x2a   : > { %p868_p2 = pnand %p867_p12, %p861_p8 }
  0x2c   : > { %871 = shalt.err (!%p868_p2)
}
  0x2d   : > { %s991_s8 = smov 512   ;;  %s992_s15 = smov 32  }
  0x2e   : > { %775 = dma.hbm_to_vmem [thread:$0]  (!%p1088_p5), %s1369_s0, 1024, %s1080_s24, [#allocation3], %s991_s8, %s991_s8, %s992_s15  }
  0x2f   : > { %p29_p10 = scmp.ge.s32.totalorder %s28_s27, 2  ;;  %s64_s23 = sadd.s32 1, %s976_s11 }
  0x30   : > { %s146_s28 = sand.u32 1, %s976_s11   ;;  %s630_s3 = sshll.u32 %s984_s13, 8 }
  0x31   : > { %s1399_s27 = smov (%p29_p10, %s28_s27), 0  ;;  %s618_s29 = sshll.u32 %s146_s28, 10 }
  0x32   : > { %s61_s30 = ssub.s32 %s984_s13, %s1399_s27  ;;  %s1132_s5 = scalar_lea.hbm %s1370_s1, %s630_s3 }
  0x33   : > { %p62_p3 = scmp.eq.s32.totalorder %s61_s30, 0  ;;  %s150_s24 = scalar_lea.vmem [#allocation5], %s618_s29 }
  0x34   : > { %s157_s6 = sshll.u32 %s150_s24, 4  ;;  %s1139_s15 = scalar_lea.sflag [#allocation6], %s146_s28  ;;  %s1137_s6 = int_to_ptr.vmem [resolvable:$true] %s157_s6 }
  0x35   : > { %s1135_s7 = scalar_select %p62_p3, %s976_s11, %s64_s23  }
  0x36   : > { %s872_s16 = scalar_lea.hbm %s1132_s5, 16384  ;;  %p1386_p8 = scmp.ne.s32.totalorder %s1385_s26, 0 }
  0x37   : > { %p873_p6 = scmp.ne.s32.totalorder %s1132_s5, %s872_s16  ;;  %s877_s3 = scalar_lea.hbm %s1370_s1, 32768 }
  0x38   : > { %p874_p12 = pneg %p1386_p8  ;;  %p878_p2 = scmp.lt.u32.totalorder %s1132_s5, %s1370_s1 }
  0x39   : > { %p879_p7 = scmp.lt.u32.totalorder %s877_s3, %s872_s16  ;;  %p881_p11 = scmp.lt.u32.totalorder %s872_s16, %s1132_s5 }
  0x3a   : > { %p875_p0 = pnand %p874_p12, %p873_p6 }
  0x3b   : > { %p880_p9 = por %p879_p7, %p878_p2 }
  0x3c   : > { %p876_p5 = pneg %p875_p0 }
  0x3d   : > { %p882_p13 = por %p881_p11, %p880_p9 }
  0x3f   : > { %p883_p4 = pnand %p882_p13, %p876_p5 }
  0x41   : > { %886 = shalt.err (!%p883_p4)
}
  0x42   : > { %s887_s23 = scalar_lea.vmem %s1137_s6, 16384  ;;  %s993_s28 = smov [#allocation5]  }
  0x43   : > { %p888_p1 = scmp.ne.s32.totalorder %s1137_s6, %s887_s23  ;;  %s892_s25 = sshll.u32 %s993_s28, 4  ;;  %s893_s25 = int_to_ptr.vmem [resolvable:$false] %s892_s25 }
  0x44   : > { %s894_s24 = scalar_lea.vmem %s893_s25, 32768  ;;  %p895_p6 = scmp.lt.s32.totalorder %s1137_s6, %s893_s25 }
  0x45   : > { %p890_p10 = pnand %p888_p1, %p874_p12  ;;  %p896_p0 = scmp.lt.s32.totalorder %s894_s24, %s887_s23 }
  0x47   : > { %p891_p3 = pneg %p890_p10  ;;  %p897_p2 = por %p896_p0, %p895_p6 }
  0x49   : > { %p898_p7 = pnand %p897_p2, %p891_p3 }
  0x4b   : > { %901 = shalt.err (!%p898_p7)
}
  0x4c   : > { %s994_s16 = smov 256   ;;  %s995_s18 = smov 16  }
  0x4d   : > { %779 = dma.hbm_to_vmem [thread:$0]  (!%p1386_p8), %s1132_s5, 16384, %s1137_s6, %s1139_s15, %s991_s8, %s994_s16, %s995_s18  }
  0x4e   : > { %p1387_p12 = scmp.ne.s32.totalorder %s1383_s22, 0 }
  0x4f   : > { %p1388_p5 = scmp.ne.s32.totalorder (!%p1387_p12), %s1378_s17, 0 }
  0x50   : > { %169 = sbr.rel (%p1387_p12) target bundleno = 396 (0x18c), region = 28 }
  0x57   : > { %955 = dma.done.wait (%p1388_p5), [#allocation3], 1024  }
  0x58   : > { %957 = vsyncadd (%p1388_p5), [#allocation3], 4294966272  ;;  %s1175_s30 = sand.u32 1, %s972_s10   ;;  %p1389_p8 = scmp.ne.s32.totalorder %s1380_s19, 0 }
  0x59   : > { %s623_s3 = sshll.u32 %s1175_s30, 10  ;;  %s176_s29 = scalar_lea.sflag [#allocation6], %s1175_s30 }
  0x5a   : > { %s1179_s26 = scalar_lea.vmem [#allocation5], %s623_s3 }
  0x5b   : > { %959 = dma.done.wait (%p1389_p8), %s176_s29, 16384  }
  0x5c   : > { %961 = vsyncadd (%p1389_p8), %s176_s29, 4294950912  ;;  %v213_v0 = vld [vmem:[%s1179_s26 + $0x8] sm:$0xff]  ;;  %v215_v1 = vld [vmem:[%s1179_s26 + $0x18] sm:$0xff]  ;;  %s624_s17 = sshll.u32 %s1175_s30, 5  ;;  %s631_s8 = sshll.u32 %s980_s12, 8 }
  0x5d   : > { %v277_v2 = vld [vmem:[%s1179_s26 + $0x208] sm:$0xff]  ;;  %v632_v3 = vpack.c.bf16 %v215_v1, %v213_v0  ;;  %v279_v4 = vld [vmem:[%s1179_s26 + $0x218] sm:$0xff]  ;;  %v212_v5 = vld [vmem:[%s1179_s26] sm:$0xff]  ;;  %s199_s19 = scalar_lea.vmem [#allocation7], %s624_s17  ;;  %s1320_s15 = scalar_lea.hbm %s1371_s2, %s631_s8 }
  0x5e   : > { %v214_v6 = vld [vmem:[%s1179_s26 + $0x10] sm:$0xff]  ;;  %v696_v7 = vpack.c.bf16 %v279_v4, %v277_v2  ;;  %v276_v9 = vld [vmem:[%s1179_s26 + $0x200] sm:$0xff]  ;;  %v217_v11 = vld [vmem:[%s1179_s26 + $0x28] sm:$0xff]  ;;  %s515_s22 = sshll.u32 %s199_s19, 4  ;;  %s499_s12 = scalar_lea.sflag [#allocation4], %s1175_s30  ;;  %s1315_s22 = int_to_ptr.vmem [resolvable:$true] %s515_s22 }
  0x5f   : > { %v634_v8 = vpack.c.bf16 %v214_v6, %v212_v5  ;;  %v278_v10 = vld [vmem:[%s1179_s26 + $0x210] sm:$0xff]  ;;  %633 = vmatprep.subr.bf16.mxu1 %v632_v3  ;;  %v219_v13 = vld [vmem:[%s1179_s26 + $0x38] sm:$0xff]  ;;  %v281_v14 = vld [vmem:[%s1179_s26 + $0x228] sm:$0xff]  ;;  %s902_s4 = scalar_lea.vmem %s1315_s22, 512  ;;  %p1390_p11 = scmp.ne.s32.totalorder %s1381_s20, 0 }
  0x60   : > { %v698_v12 = vpack.c.bf16 %v278_v10, %v276_v9  ;;  %v283_v15 = vld [vmem:[%s1179_s26 + $0x238] sm:$0xff]  ;;  %697 = vmatprep.subr.bf16.mxu0 %v696_v7  ;;  %v636_v16 = vpack.c.bf16 %v219_v13, %v217_v11  ;;  %v216_v18 = vld [vmem:[%s1179_s26 + $0x20] sm:$0xff]  ;;  %v218_v19 = vld [vmem:[%s1179_s26 + $0x30] sm:$0xff]  ;;  %p903_p9 = scmp.ne.s32.totalorder %s1315_s22, %s902_s4  ;;  %s996_s23 = smov [#allocation7]  }
  0x61   : > { %635 = vmatpush1.bf16.msra.mxu1 %v634_v8  ;;  %v700_v17 = vpack.c.bf16 %v283_v15, %v281_v14  ;;  %v280_v20 = vld [vmem:[%s1179_s26 + $0x220] sm:$0xff]  ;;  %v638_v21 = vpack.c.bf16 %v218_v19, %v216_v18  ;;  %v282_v22 = vld [vmem:[%s1179_s26 + $0x230] sm:$0xff]  ;;  %v221_v23 = vld [vmem:[%s1179_s26 + $0x48] sm:$0xff]  ;;  %s906_s28 = sshll.u32 %s996_s23, 4  ;;  %s907_s28 = int_to_ptr.vmem [resolvable:$false] %s906_s28 }
  0x62   : > { %699 = vmatpush1.bf16.msra.mxu0 %v698_v12  ;;  %v223_v24 = vld [vmem:[%s1179_s26 + $0x58] sm:$0xff]  ;;  %637 = vmatprep.subr.bf16.mxu1 %v636_v16  ;;  %v702_v25 = vpack.c.bf16 %v282_v22, %v280_v20  ;;  %v285_v27 = vld [vmem:[%s1179_s26 + $0x248] sm:$0xff]  ;;  %v220_v29 = vld [vmem:[%s1179_s26 + $0x40] sm:$0xff]  ;;  %p904_p13 = pnand %p903_p9, %p1390_p11  ;;  %s908_s25 = scalar_lea.vmem %s907_s28, 1024 }
  0x63   : > { %701 = vmatprep.subr.bf16.mxu0 %v700_v17  ;;  %v640_v26 = vpack.c.bf16 %v223_v24, %v221_v23  ;;  %v287_v28 = vld [vmem:[%s1179_s26 + $0x258] sm:$0xff]  ;;  %v222_v31 = vld [vmem:[%s1179_s26 + $0x50] sm:$0xff]  ;;  %v284_v32 = vld [vmem:[%s1179_s26 + $0x240] sm:$0xff]  ;;  %p909_p1 = scmp.lt.s32.totalorder %s1315_s22, %s907_s28  ;;  %p910_p10 = scmp.lt.s32.totalorder %s908_s25, %s902_s4 }
  0x64   : > { %v704_v30 = vpack.c.bf16 %v287_v28, %v285_v27  ;;  %v286_v33 = vld [vmem:[%s1179_s26 + $0x250] sm:$0xff]  ;;  %v642_v34 = vpack.c.bf16 %v222_v31, %v220_v29  ;;  %v225_v35 = vld [vmem:[%s1179_s26 + $0x68] sm:$0xff]  ;;  %v227_v36 = vld [vmem:[%s1179_s26 + $0x78] sm:$0xff]  ;;  %p905_p4 = pneg %p904_p13 }
  0x65   : > { %639 = vmatpush1.bf16.msra.mxu1 %v638_v21  ;;  %v289_v37 = vld [vmem:[%s1179_s26 + $0x268] sm:$0xff]  ;;  %v706_v38 = vpack.c.bf16 %v286_v33, %v284_v32  ;;  %v644_v39 = vpack.c.bf16 %v227_v36, %v225_v35  ;;  %v291_v40 = vld [vmem:[%s1179_s26 + $0x278] sm:$0xff]  ;;  %v224_v41 = vld [vmem:[%s1179_s26 + $0x60] sm:$0xff]  ;;  %p911_p3 = por %p910_p10, %p909_p1 }
  0x66   : > { %703 = vmatpush1.bf16.msra.mxu0 %v702_v25  ;;  %641 = vmatprep.subr.bf16.mxu1 %v640_v26  ;;  %v226_v42 = vld [vmem:[%s1179_s26 + $0x70] sm:$0xff]  ;;  %v708_v43 = vpack.c.bf16 %v291_v40, %v289_v37  ;;  %v288_v44 = vld [vmem:[%s1179_s26 + $0x260] sm:$0xff]  ;;  %v229_v46 = vld [vmem:[%s1179_s26 + $0x88] sm:$0xff] }
  0x67   : > { %705 = vmatprep.subr.bf16.mxu0 %v704_v30  ;;  %v290_v45 = vld [vmem:[%s1179_s26 + $0x270] sm:$0xff]  ;;  %v231_v47 = vld [vmem:[%s1179_s26 + $0x98] sm:$0xff]  ;;  %v293_v48 = vld [vmem:[%s1179_s26 + $0x288] sm:$0xff]  ;;  %v646_v50 = vpack.c.bf16 %v226_v42, %v224_v41  ;;  %p912_p6 = pnand %p911_p3, %p905_p4 }
  0x68   : > { %v295_v49 = vld [vmem:[%s1179_s26 + $0x298] sm:$0xff]  ;;  %v710_v51 = vpack.c.bf16 %v290_v45, %v288_v44  ;;  %v648_v52 = vpack.c.bf16 %v231_v47, %v229_v46  ;;  %v228_v53 = vld [vmem:[%s1179_s26 + $0x80] sm:$0xff]  ;;  %v230_v54 = vld [vmem:[%s1179_s26 + $0x90] sm:$0xff] }
  0x69   : > { %643 = vmatpush1.bf16.msra.mxu1 %v642_v34  ;;  %v292_v55 = vld [vmem:[%s1179_s26 + $0x280] sm:$0xff]  ;;  %v712_v56 = vpack.c.bf16 %v295_v49, %v293_v48  ;;  %v294_v57 = vld [vmem:[%s1179_s26 + $0x290] sm:$0xff]  ;;  %v233_v58 = vld [vmem:[%s1179_s26 + $0xa8] sm:$0xff]  ;;  %v650_v62 = vpack.c.bf16 %v230_v54, %v228_v53 }
  0x6a   : > { %707 = vmatpush1.bf16.msra.mxu0 %v706_v38  ;;  %645 = vmatprep.subr.bf16.mxu1 %v644_v39  ;;  %v235_v59 = vld [vmem:[%s1179_s26 + $0xb8] sm:$0xff]  ;;  %v297_v60 = vld [vmem:[%s1179_s26 + $0x2a8] sm:$0xff]  ;;  %v714_v63 = vpack.c.bf16 %v294_v57, %v292_v55  ;;  %v232_v1 = vld [vmem:[%s1179_s26 + $0xa0] sm:$0xff] }
  0x6b   : > { %709 = vmatprep.subr.bf16.mxu0 %v708_v43  ;;  %v299_v61 = vld [vmem:[%s1179_s26 + $0x2b8] sm:$0xff]  ;;  %v652_v0 = vpack.c.bf16 %v235_v59, %v233_v58  ;;  %v234_v2 = vld [vmem:[%s1179_s26 + $0xb0] sm:$0xff]  ;;  %v296_v3 = vld [vmem:[%s1179_s26 + $0x2a0] sm:$0xff] }
  0x6c   : > { %v716_v4 = vpack.c.bf16 %v299_v61, %v297_v60  ;;  %v298_v5 = vld [vmem:[%s1179_s26 + $0x2b0] sm:$0xff]  ;;  %v237_v6 = vld [vmem:[%s1179_s26 + $0xc8] sm:$0xff]  ;;  %v239_v7 = vld [vmem:[%s1179_s26 + $0xd8] sm:$0xff]  ;;  %v654_v10 = vpack.c.bf16 %v234_v2, %v232_v1 }
  0x6d   : > { %647 = vmatpush1.bf16.msra.mxu1 %v646_v50  ;;  %v301_v8 = vld [vmem:[%s1179_s26 + $0x2c8] sm:$0xff]  ;;  %v303_v9 = vld [vmem:[%s1179_s26 + $0x2d8] sm:$0xff]  ;;  %v718_v11 = vpack.c.bf16 %v298_v5, %v296_v3  ;;  %v656_v12 = vpack.c.bf16 %v239_v7, %v237_v6  ;;  %v236_v13 = vld [vmem:[%s1179_s26 + $0xc0] sm:$0xff] }
  0x6e   : > { %711 = vmatpush1.bf16.msra.mxu0 %v710_v51  ;;  %649 = vmatprep.subr.bf16.mxu1 %v648_v52  ;;  %v238_v14 = vld [vmem:[%s1179_s26 + $0xd0] sm:$0xff]  ;;  %v300_v15 = vld [vmem:[%s1179_s26 + $0x2c0] sm:$0xff]  ;;  %v720_v16 = vpack.c.bf16 %v303_v9, %v301_v8  ;;  %v241_v18 = vld [vmem:[%s1179_s26 + $0xe8] sm:$0xff] }
  0x6f   : > { %713 = vmatprep.subr.bf16.mxu0 %v712_v56  ;;  %v302_v17 = vld [vmem:[%s1179_s26 + $0x2d0] sm:$0xff]  ;;  %v243_v19 = vld [vmem:[%s1179_s26 + $0xf8] sm:$0xff]  ;;  %v305_v20 = vld [vmem:[%s1179_s26 + $0x2e8] sm:$0xff]  ;;  %v658_v22 = vpack.c.bf16 %v238_v14, %v236_v13 }
  0x70   : > { %v307_v21 = vld [vmem:[%s1179_s26 + $0x2f8] sm:$0xff]  ;;  %v722_v23 = vpack.c.bf16 %v302_v17, %v300_v15  ;;  %v660_v24 = vpack.c.bf16 %v243_v19, %v241_v18  ;;  %v240_v25 = vld [vmem:[%s1179_s26 + $0xe0] sm:$0xff]  ;;  %v242_v26 = vld [vmem:[%s1179_s26 + $0xf0] sm:$0xff] }
  0x71   : > { %651 = vmatpush1.bf16.msra.mxu1 %v650_v62  ;;  %v304_v27 = vld [vmem:[%s1179_s26 + $0x2e0] sm:$0xff]  ;;  %v724_v28 = vpack.c.bf16 %v307_v21, %v305_v20  ;;  %v306_v29 = vld [vmem:[%s1179_s26 + $0x2f0] sm:$0xff]  ;;  %v245_v30 = vld [vmem:[%s1179_s26 + $0x108] sm:$0xff]  ;;  %v662_v34 = vpack.c.bf16 %v242_v26, %v240_v25 }
  0x72   : > { %715 = vmatpush1.bf16.msra.mxu0 %v714_v63  ;;  %653 = vmatprep.subr.bf16.mxu1 %v652_v0  ;;  %v247_v31 = vld [vmem:[%s1179_s26 + $0x118] sm:$0xff]  ;;  %v309_v32 = vld [vmem:[%s1179_s26 + $0x308] sm:$0xff]  ;;  %v726_v35 = vpack.c.bf16 %v306_v29, %v304_v27  ;;  %v244_v37 = vld [vmem:[%s1179_s26 + $0x100] sm:$0xff] }
  0x73   : > { %717 = vmatprep.subr.bf16.mxu0 %v716_v4  ;;  %v311_v33 = vld [vmem:[%s1179_s26 + $0x318] sm:$0xff]  ;;  %v664_v36 = vpack.c.bf16 %v247_v31, %v245_v30  ;;  %v246_v38 = vld [vmem:[%s1179_s26 + $0x110] sm:$0xff]  ;;  %v308_v39 = vld [vmem:[%s1179_s26 + $0x300] sm:$0xff] }
  0x74   : > { %v728_v40 = vpack.c.bf16 %v311_v33, %v309_v32  ;;  %v310_v41 = vld [vmem:[%s1179_s26 + $0x310] sm:$0xff]  ;;  %v249_v42 = vld [vmem:[%s1179_s26 + $0x128] sm:$0xff]  ;;  %v251_v43 = vld [vmem:[%s1179_s26 + $0x138] sm:$0xff]  ;;  %v666_v46 = vpack.c.bf16 %v246_v38, %v244_v37 }
  0x75   : > { %655 = vmatpush1.bf16.msra.mxu1 %v654_v10  ;;  %v313_v44 = vld [vmem:[%s1179_s26 + $0x328] sm:$0xff]  ;;  %v315_v45 = vld [vmem:[%s1179_s26 + $0x338] sm:$0xff]  ;;  %v730_v47 = vpack.c.bf16 %v310_v41, %v308_v39  ;;  %v668_v48 = vpack.c.bf16 %v251_v43, %v249_v42  ;;  %v248_v49 = vld [vmem:[%s1179_s26 + $0x120] sm:$0xff] }
  0x76   : > { %719 = vmatpush1.bf16.msra.mxu0 %v718_v11  ;;  %657 = vmatprep.subr.bf16.mxu1 %v656_v12  ;;  %v250_v50 = vld [vmem:[%s1179_s26 + $0x130] sm:$0xff]  ;;  %v312_v51 = vld [vmem:[%s1179_s26 + $0x320] sm:$0xff]  ;;  %v732_v52 = vpack.c.bf16 %v315_v45, %v313_v44  ;;  %v253_v54 = vld [vmem:[%s1179_s26 + $0x148] sm:$0xff] }
  0x77   : > { %721 = vmatprep.subr.bf16.mxu0 %v720_v16  ;;  %v314_v53 = vld [vmem:[%s1179_s26 + $0x330] sm:$0xff]  ;;  %v255_v55 = vld [vmem:[%s1179_s26 + $0x158] sm:$0xff]  ;;  %v317_v56 = vld [vmem:[%s1179_s26 + $0x348] sm:$0xff]  ;;  %v670_v58 = vpack.c.bf16 %v250_v50, %v248_v49 }
  0x78   : > { %v319_v57 = vld [vmem:[%s1179_s26 + $0x358] sm:$0xff]  ;;  %v734_v59 = vpack.c.bf16 %v314_v53, %v312_v51  ;;  %v672_v60 = vpack.c.bf16 %v255_v55, %v253_v54  ;;  %v252_v61 = vld [vmem:[%s1179_s26 + $0x140] sm:$0xff]  ;;  %v254_v62 = vld [vmem:[%s1179_s26 + $0x150] sm:$0xff] }
  0x79   : > { %659 = vmatpush1.bf16.msra.mxu1 %v658_v22  ;;  %v316_v63 = vld [vmem:[%s1179_s26 + $0x340] sm:$0xff]  ;;  %v736_v0 = vpack.c.bf16 %v319_v57, %v317_v56  ;;  %v318_v1 = vld [vmem:[%s1179_s26 + $0x350] sm:$0xff]  ;;  %v257_v2 = vld [vmem:[%s1179_s26 + $0x168] sm:$0xff]  ;;  %v674_v6 = vpack.c.bf16 %v254_v62, %v252_v61 }
  0x7a   : > { %723 = vmatpush1.bf16.msra.mxu0 %v722_v23  ;;  %661 = vmatprep.subr.bf16.mxu1 %v660_v24  ;;  %v259_v3 = vld [vmem:[%s1179_s26 + $0x178] sm:$0xff]  ;;  %v321_v4 = vld [vmem:[%s1179_s26 + $0x368] sm:$0xff]  ;;  %v256_v7 = vld [vmem:[%s1179_s26 + $0x160] sm:$0xff]  ;;  %v738_v8 = vpack.c.bf16 %v318_v1, %v316_v63 }
  0x7b   : > { %725 = vmatprep.subr.bf16.mxu0 %v724_v28  ;;  %v323_v5 = vld [vmem:[%s1179_s26 + $0x378] sm:$0xff]  ;;  %v676_v9 = vpack.c.bf16 %v259_v3, %v257_v2  ;;  %v258_v10 = vld [vmem:[%s1179_s26 + $0x170] sm:$0xff]  ;;  %v320_v11 = vld [vmem:[%s1179_s26 + $0x360] sm:$0xff] }
  0x7c   : > { %v322_v12 = vld [vmem:[%s1179_s26 + $0x370] sm:$0xff]  ;;  %v740_v13 = vpack.c.bf16 %v323_v5, %v321_v4  ;;  %v261_v14 = vld [vmem:[%s1179_s26 + $0x188] sm:$0xff]  ;;  %v263_v15 = vld [vmem:[%s1179_s26 + $0x198] sm:$0xff]  ;;  %v678_v20 = vpack.c.bf16 %v258_v10, %v256_v7 }
  0x7d   : > { %663 = vmatpush1.bf16.msra.mxu1 %v662_v34  ;;  %v205_v16 = vld [vmem:[#allocation2 + $0x8] sm:$0xff]  ;;  %v327_v18 = vld [vmem:[%s1179_s26 + $0x398] sm:$0xff]  ;;  %v742_v21 = vpack.c.bf16 %v322_v12, %v320_v11  ;;  %v680_v22 = vpack.c.bf16 %v263_v15, %v261_v14  ;;  %v260_v23 = vld [vmem:[%s1179_s26 + $0x180] sm:$0xff] }
  0x7e   : > { %727 = vmatpush1.bf16.msra.mxu0 %v726_v35  ;;  %665 = vmatprep.subr.bf16.mxu1 %v664_v36  ;;  %v325_v17 = vld [vmem:[%s1179_s26 + $0x388] sm:$0xff]  ;;  %v207_v19 = vld [vmem:[#allocation2 + $0x18] sm:$0xff]  ;;  %v262_v24 = vld [vmem:[%s1179_s26 + $0x190] sm:$0xff] }
  0x7f   : > { %729 = vmatprep.subr.bf16.mxu0 %v728_v40  ;;  %404 = vmatprep.mubr.f32.mxu1 %v205_v16  ;;  %v324_v25 = vld [vmem:[%s1179_s26 + $0x380] sm:$0xff]  ;;  %v744_v26 = vpack.c.bf16 %v327_v18, %v325_v17  ;;  %v326_v27 = vld [vmem:[%s1179_s26 + $0x390] sm:$0xff]  ;;  %v265_v28 = vld [vmem:[%s1179_s26 + $0x1a8] sm:$0xff]  ;;  %v682_v32 = vpack.c.bf16 %v262_v24, %v260_v23 }
  0x80   : > { %481 = vmatprep.mubr.f32.mxu0 %v207_v19  ;;  %v267_v29 = vld [vmem:[%s1179_s26 + $0x1b8] sm:$0xff]  ;;  %v329_v30 = vld [vmem:[%s1179_s26 + $0x3a8] sm:$0xff]  ;;  %v746_v33 = vpack.c.bf16 %v326_v27, %v324_v25  ;;  %v264_v35 = vld [vmem:[%s1179_s26 + $0x1a0] sm:$0xff] }
  0x81   : > { %667 = vmatpush1.bf16.msra.mxu1 %v666_v46  ;;  %v331_v31 = vld [vmem:[%s1179_s26 + $0x3b8] sm:$0xff]  ;;  %v684_v34 = vpack.c.bf16 %v267_v29, %v265_v28  ;;  %v266_v36 = vld [vmem:[%s1179_s26 + $0x1b0] sm:$0xff]  ;;  %v328_v37 = vld [vmem:[%s1179_s26 + $0x3a0] sm:$0xff] }
  0x82   : > { %731 = vmatpush1.bf16.msra.mxu0 %v730_v47  ;;  %669 = vmatprep.subr.bf16.mxu1 %v668_v48  ;;  %v748_v38 = vpack.c.bf16 %v331_v31, %v329_v30  ;;  %v330_v39 = vld [vmem:[%s1179_s26 + $0x3b0] sm:$0xff]  ;;  %v269_v40 = vld [vmem:[%s1179_s26 + $0x1c8] sm:$0xff]  ;;  %v271_v41 = vld [vmem:[%s1179_s26 + $0x1d8] sm:$0xff]  ;;  %v686_v44 = vpack.c.bf16 %v266_v36, %v264_v35 }
  0x83   : > { %733 = vmatprep.subr.bf16.mxu0 %v732_v52  ;;  %v333_v42 = vld [vmem:[%s1179_s26 + $0x3c8] sm:$0xff]  ;;  %v335_v43 = vld [vmem:[%s1179_s26 + $0x3d8] sm:$0xff]  ;;  %v750_v45 = vpack.c.bf16 %v330_v39, %v328_v37  ;;  %v688_v46 = vpack.c.bf16 %v271_v41, %v269_v40  ;;  %v268_v47 = vld [vmem:[%s1179_s26 + $0x1c0] sm:$0xff] }
  0x84   : > { %v270_v48 = vld [vmem:[%s1179_s26 + $0x1d0] sm:$0xff]  ;;  %v332_v49 = vld [vmem:[%s1179_s26 + $0x3c0] sm:$0xff]  ;;  %v752_v50 = vpack.c.bf16 %v335_v43, %v333_v42  ;;  %v273_v52 = vld [vmem:[%s1179_s26 + $0x1e8] sm:$0xff] }
  0x85   : > { %671 = vmatpush1.bf16.msra.mxu1 %v670_v58  ;;  %v334_v51 = vld [vmem:[%s1179_s26 + $0x3d0] sm:$0xff]  ;;  %v275_v53 = vld [vmem:[%s1179_s26 + $0x1f8] sm:$0xff]  ;;  %v337_v54 = vld [vmem:[%s1179_s26 + $0x3e8] sm:$0xff]  ;;  %v690_v56 = vpack.c.bf16 %v270_v48, %v268_v47 }
  0x86   : > { %735 = vmatpush1.bf16.msra.mxu0 %v734_v59  ;;  %673 = vmatprep.subr.bf16.mxu1 %v672_v60  ;;  %v339_v55 = vld [vmem:[%s1179_s26 + $0x3f8] sm:$0xff]  ;;  %v754_v57 = vpack.c.bf16 %v334_v51, %v332_v49  ;;  %v692_v58 = vpack.c.bf16 %v275_v53, %v273_v52  ;;  %v272_v59 = vld [vmem:[%s1179_s26 + $0x1e0] sm:$0xff]  ;;  %v274_v60 = vld [vmem:[%s1179_s26 + $0x1f0] sm:$0xff] }
  0x87   : > { %737 = vmatprep.subr.bf16.mxu0 %v736_v0  ;;  %v756_v61 = vpack.c.bf16 %v339_v55, %v337_v54  ;;  %v336_v62 = vld [vmem:[%s1179_s26 + $0x3e0] sm:$0xff]  ;;  %v338_v63 = vld [vmem:[%s1179_s26 + $0x3f0] sm:$0xff]  ;;  %v694_v0 = vpack.c.bf16 %v274_v60, %v272_v59  ;;  %v209_v4 = vld [vmem:[#allocation2 + $0x28] sm:$0xff] }
  0x88   : > { %v758_v1 = vpack.c.bf16 %v338_v63, %v336_v62  ;;  %v204_v2 = vld [vmem:[#allocation2] sm:$0xff]  ;;  %v206_v3 = vld [vmem:[#allocation2 + $0x10] sm:$0xff]  ;;  %v211_v5 = vld [vmem:[#allocation2 + $0x38] sm:$0xff] }
  0x89   : > { %675 = vmatpush1.bf16.msra.mxu1 %v674_v6  ;;  %v208_v6 = vld [vmem:[#allocation2 + $0x20] sm:$0xff]  ;;  %v210_v7 = vld [vmem:[#allocation2 + $0x30] sm:$0xff] }
  0x8a   : > { %739 = vmatpush1.bf16.msra.mxu0 %v738_v8  ;;  %677 = vmatprep.subr.bf16.mxu1 %v676_v9 }
  0x8b   : > { %741 = vmatprep.subr.bf16.mxu0 %v740_v13 }
  0x8d   : > { %679 = vmatpush1.bf16.msra.mxu1 %v678_v20 }
  0x8e   : > { %743 = vmatpush1.bf16.msra.mxu0 %v742_v21  ;;  %681 = vmatprep.subr.bf16.mxu1 %v680_v22 }
  0x8f   : > { %745 = vmatprep.subr.bf16.mxu0 %v744_v26 }
  0x91   : > { %683 = vmatpush1.bf16.msra.mxu1 %v682_v32 }
  0x92   : > { %747 = vmatpush1.bf16.msra.mxu0 %v746_v33  ;;  %685 = vmatprep.subr.bf16.mxu1 %v684_v34 }
  0x93   : > { %749 = vmatprep.subr.bf16.mxu0 %v748_v38 }
  0x95   : > { %687 = vmatpush1.bf16.msra.mxu1 %v686_v44 }
  0x96   : > { %751 = vmatpush1.bf16.msra.mxu0 %v750_v45  ;;  %689 = vmatprep.subr.bf16.mxu1 %v688_v46 }
  0x97   : > { %753 = vmatprep.subr.bf16.mxu0 %v752_v50 }
  0x99   : > { %691 = vmatpush1.bf16.msra.mxu1 %v690_v56 }
  0x9a   : > { %755 = vmatpush1.bf16.msra.mxu0 %v754_v57  ;;  %693 = vmatprep.subr.bf16.mxu1 %v692_v58 }
  0x9b   : > { %757 = vmatprep.subr.bf16.mxu0 %v756_v61 }
  0x9d   : > { %695 = vmatpush1.bf16.msra.mxu1 %v694_v0 }
  0x9e   : > { %759 = vmatpush1.bf16.msra.mxu0 %v758_v1 }
  0xa0   : > { %405 = vmatmul.mubr.f32.vlgmr.msra.gmra.mrb[0].mxu1 %v204_v2 }
  0xa1   : > { %482 = vmatmul.mubr.f32.vlgmr.msra.gmra.mrb[0].mxu0 %v206_v3  ;;  %410 = vmatprep.mubr.f32.mxu1 %v209_v4 }
  0xa2   : > { %487 = vmatprep.mubr.f32.mxu0 %v211_v5 }
  0xa4   : > { %411 = vmatmul.mubr.f32.gmra.mrb[2].mxu1 %v208_v6 }
  0xa5   : > { %488 = vmatmul.mubr.f32.gmra.mrb[2].mxu0 %v210_v7 }
 0x173   : > { %v406_v8 = vpop.f32.mrb[0].mxu1 }
 0x174   : > { %v483_v9 = vpop.f32.mrb[0].mxu0  ;;  %v408_v10 = vpop.f32.mrb[1].mxu1 }
 0x175   : > { %v484_v11 = vadd.f32 %v483_v9, %v406_v8  ;;  %v485_v12 = vpop.f32.mrb[1].mxu0 }
 0x176   : > { %v486_v13 = vadd.f32 %v485_v12, %v408_v10 }
 0x177   : > { %494 = vst [vmem:[%s199_s19] sm:$0xff] %v484_v11  ;;  %v412_v14 = vpop.f32.mrb[2].mxu1 }
 0x178   : > { %495 = vst [vmem:[%s199_s19 + $0x8] sm:$0xff] %v486_v13  ;;  %v489_v15 = vpop.f32.mrb[2].mxu0  ;;  %v414_v16 = vpop.f32.mrb[3].mxu1 }
 0x179   : > { %v490_v17 = vadd.f32 %v489_v15, %v412_v14  ;;  %v491_v18 = vpop.f32.mrb[3].mxu0 }
 0x17a   : > { %v492_v19 = vadd.f32 %v491_v18, %v414_v16 }
 0x17b   : > { %496 = vst [vmem:[%s199_s19 + $0x10] sm:$0xff] %v490_v17 }
 0x17c   : > { %497 = vst [vmem:[%s199_s19 + $0x18] sm:$0xff] %v492_v19 }
 0x17d   : > { %915 = shalt.err (!%p912_p6)
}
 0x17e   : > { %s916_s24 = scalar_lea.hbm %s1320_s15, 512  ;;  %s920_s3 = scalar_lea.hbm %s1371_s2, 1024 }
 0x17f   : > { %p917_p0 = scmp.ne.s32.totalorder %s1320_s15, %s916_s24  ;;  %p921_p12 = scmp.lt.u32.totalorder %s1320_s15, %s1371_s2 }
 0x180   : > { %p922_p5 = scmp.lt.u32.totalorder %s920_s3, %s916_s24  ;;  %p924_p9 = scmp.lt.u32.totalorder %s916_s24, %s1320_s15 }
 0x181   : > { %p918_p2 = pnand %p917_p0, %p1390_p11 }
 0x182   : > { %p923_p8 = por %p922_p5, %p921_p12 }
 0x183   : > { %p919_p7 = pneg %p918_p2 }
 0x184   : > { %p925_p13 = por %p924_p9, %p923_p8 }
 0x186   : > { %p926_p4 = pnand %p925_p13, %p919_p7 }
 0x188   : > { %929 = shalt.err (!%p926_p4)
}
 0x189   : > { %s997_s17 = smov 256   ;;  %s998_s19 = smov 512  }
 0x18a   : > { %s999_s8 = smov 16  }
 0x18b   : > { %770 = dma.vmem_to_hbm [thread:$0]  (%p1390_p11), %s1315_s22, 512, %s1320_s15, %s499_s12, %s997_s17, %s998_s19, %s999_s8  }
 0x18c PF: > { %s530_s5 = sand.u32 1, %s968_s9   ;;  %p1391_p1 = scmp.ne.s32.totalorder %s1382_s21, 0 }
 0x18d   : > { %p1392_p10 = scmp.ge.s32.totalorder %s988_s14, 2  ;;  %s531_s6 = scalar_lea.sflag [#allocation4], %s530_s5 }
 0x18f   : > { %p781_p3 = pnand %p1392_p10, %p1391_p1 }
 0x191   : > { %963 = dma.done.wait (!%p781_p3), %s531_s6, 512  }
 0x192   : > { %965 = vsyncadd (!%p781_p3), %s531_s6, 4294966784  ;;  %s19_s14 = sadd.s32 1, %s988_s14   ;;  %s1393_s9 = smov %s972_s10 }
 0x193   : > { %p16_p6 = scmp.ge.s32.totalorder %s19_s14, 4   ;;  %s1394_s10 = smov %s976_s11 }
 0x194   : > { %s1395_s11 = smov %s1135_s7  ;;  %s1396_s12 = smov %s984_s13 }
 0x195   : > { %s1397_s13 = smov %s1399_s27  ;;  %18 = sbr.rel (!%p16_p6) target bundleno = 7 (0x7), region = 79 }
 0x19c   :  { %536 = vsyncpa [#allocation3], 1 }
 0x19d   :  { %538 = vsyncpa [#allocation3 + $0x1], 1 }
 0x19e   :  { %539 = vsyncpa [#allocation6], 1 }
 0x19f   :  { %541 = vsyncpa [#allocation6 + $0x1], 1 }
 0x1a0   :  { %542 = vsyncpa [#allocation4], 1 }
 0x1a1   :  { %544 = vsyncpa [#allocation4 + $0x1], 1 }

</bundles_post_ra>
